<compile_context>
chip_gen: v7x
topology: tpu7x:2x2x1
jax: 0.10.0
libtpu: 0.0.40
codegen_flags: <defaults>
</compile_context>

<pallas_src>
import math

import jax
import jax.numpy as jnp
from jax.experimental import pallas as pl
from jax.experimental.pallas import tpu as pltpu

LN_EPS = 1e-5  # torch.nn.LayerNorm default eps


# ---------------------------------------------------------------------------
# Fused multi-layer LSTM-cell kernel.  Grid = (layer_num,), one step per layer.
#   x0    : (B, Dmax)        initial input, zero-padded to Dmax = max(D_in, H)
#   hn    : (L, B, H)        per-layer previous hidden state
#   cn    : (L, B, H)        per-layer previous cell state
#   wh    : (L, 4, H, H)     bf16, per-gate hx-weights, pre-transposed (K, H_out)
#   wx    : (L, 4, Dmax, H)  bf16, per-gate x-weights, pre-transposed + zero-padded
#   b     : (L, 4, 1, H)     f32 linear bias, per gate
#   lnwr  : (L, 4B, H)       f32 LayerNorm weight, pre-expanded over batch rows
#   lnbr  : (L, 4B, H)       f32 LayerNorm bias,  pre-expanded over batch rows
# outputs: h (L, B, H), c (L, B, H)
# scratch: x_sc (B, Dmax)    carried layer input (h of the previous layer)
# ---------------------------------------------------------------------------
def _fused_lstm_kernel(x0_ref, hn_ref, cn_ref, wh_ref, wx_ref, b_ref,
                       lnw_ref, lnb_ref, h_out_ref, c_out_ref, x_sc):
    layer = pl.program_id(0)
    B = cn_ref.shape[1]
    H = cn_ref.shape[2]

    # Layer 0: load the (padded) external input into the carried-activation scratch.
    @pl.when(layer == 0)
    def _():
        x_sc[...] = x0_ref[...]

    hx = hn_ref[0]            # (B, H)   f32
    cx = cn_ref[0]            # (B, H)   f32
    xin = x_sc[...]           # (B, Dmax) f32 (h of previous layer, or padded x)

    hx_b = hx.astype(jnp.bfloat16)
    xin_b = xin.astype(jnp.bfloat16)

    # Gate pre-activations: 2 accumulating MXU dots per gate, f32 accumulation.
    # Gate order matches torch .chunk(4, 1): [in, forget, cell, out].
    gate_pre = []
    for g in range(4):
        gp = (jnp.dot(hx_b, wh_ref[0, g], preferred_element_type=jnp.float32)
              + jnp.dot(xin_b, wx_ref[0, g], preferred_element_type=jnp.float32)
              + b_ref[0, g])                      # (B, H) + (1, H)
        gate_pre.append(gp)

    # Stack the 4 gates along the sublane (row) axis -> (4B, H) and do ONE
    # fused LayerNorm (two-pass mean/var for numerical stability).
    gates = jnp.concatenate(gate_pre, axis=0)     # (4B, H)
    mu = jnp.mean(gates, axis=-1, keepdims=True)
    centered = gates - mu
    var = jnp.mean(centered * centered, axis=-1, keepdims=True)
    gn = centered * jax.lax.rsqrt(var + LN_EPS) * lnw_ref[0] + lnb_ref[0]

    # Sublane-aligned splits (offsets are multiples of B).
    ig_n = gn[0 * B:1 * B, :]
    fg_n = gn[1 * B:2 * B, :]
    cg_n = gn[2 * B:3 * B, :]
    og_n = gn[3 * B:4 * B, :]

    ingate     = jax.nn.sigmoid(ig_n)
    forgetgate = jax.nn.sigmoid(fg_n)
    outgate    = jax.nn.sigmoid(og_n)
    cellgate2  = jnp.tanh(cg_n)

    c = cx * forgetgate + ingate * cellgate2
    # NOTE: the PyTorch module adds the *pre-tanh, post-LayerNorm* cell gate here.
    h = outgate * jnp.tanh(c) + cg_n

    h_out_ref[0] = h
    c_out_ref[0] = c

    # Carry h as the next layer's input (columns >= H multiply zero-padded weights).
    @pl.when(layer + 1 < pl.num_programs(0))
    def _():
        if H == x_sc.shape[1]:
            x_sc[...] = h
        else:
            x_sc[:, 0:H] = h


def lstm_cell_forward(prep, x, hn, cn):
    """Fused forward over all layers in a single pallas_call."""
    L, B, H = hn.shape
    dmax = prep["wx"].shape[2]
    D = x.shape[1]
    x_pad = x if D == dmax else jnp.pad(x, ((0, 0), (0, dmax - D)))

    h_out, c_out = pl.pallas_call(
        _fused_lstm_kernel,
        out_shape=(jax.ShapeDtypeStruct((L, B, H), jnp.float32),
                   jax.ShapeDtypeStruct((L, B, H), jnp.float32)),
        grid_spec=pltpu.PrefetchScalarGridSpec(
            num_scalar_prefetch=0,
            grid=(L,),
            in_specs=[
                pl.BlockSpec((B, dmax), lambda i: (0, 0)),          # x0 (same block)
                pl.BlockSpec((1, B, H), lambda i: (i, 0, 0)),       # hn[i]
                pl.BlockSpec((1, B, H), lambda i: (i, 0, 0)),       # cn[i]
                pl.BlockSpec((1, 4, H, H), lambda i: (i, 0, 0, 0)),       # wh[i]
                pl.BlockSpec((1, 4, dmax, H), lambda i: (i, 0, 0, 0)),    # wx[i]
                pl.BlockSpec((1, 4, 1, H), lambda i: (i, 0, 0, 0)),       # b[i]
                pl.BlockSpec((1, 4 * B, H), lambda i: (i, 0, 0)),   # ln weight (expanded)
                pl.BlockSpec((1, 4 * B, H), lambda i: (i, 0, 0)),   # ln bias   (expanded)
            ],
            out_specs=[
                pl.BlockSpec((1, B, H), lambda i: (i, 0, 0)),
                pl.BlockSpec((1, B, H), lambda i: (i, 0, 0)),
            ],
            scratch_shapes=[pltpu.VMEM((B, dmax), jnp.float32)],
        ),
        compiler_params=pltpu.CompilerParams(
            # layer axis carries state through VMEM scratch -> must stay sequential
            dimension_semantics=("arbitrary",)),
    )(x_pad, hn, cn, prep["wh"], prep["wx"], prep["b"], prep["lnw"], prep["lnb"])
    return h_out, c_out


# ---------------------------------------------------------------------------
# Parameter init (matches reset_parameters: all params ~ U(-1/sqrt(H), 1/sqrt(H)))
# ---------------------------------------------------------------------------
def init_params(key, input_size, hidden_size, layer_num):
    std = 1.0 / math.sqrt(hidden_size)
    params = []
    for i in range(layer_num):
        in_dim = (input_size + hidden_size) if i == 0 else 2 * hidden_size
        key, kw, kb, klw, klb = jax.random.split(key, 5)
        W = jax.random.uniform(kw, (4 * hidden_size, in_dim), jnp.float32, -std, std)
        b = jax.random.uniform(kb, (4 * hidden_size,), jnp.float32, -std, std)
        lnw = jax.random.uniform(klw, (4, hidden_size), jnp.float32, -std, std)
        lnb = jax.random.uniform(klb, (4, hidden_size), jnp.float32, -std, std)
        params.append({"W": W, "b": b, "lnw": lnw, "lnb": lnb})
    return params


def prepare_params(params, input_size, hidden_size, batch):
    """One-time repack: split/transpose/stack weights, bf16 cast, expand LN params."""
    H, B = hidden_size, batch
    dmax = max(input_size, H)
    wh_l, wx_l, b_l, lnw_l, lnb_l = [], [], [], [], []
    for p in params:
        W = p["W"]                                   # (4H, H + d_i), cols = [hx | x]
        d_i = W.shape[1] - H
        Wg = W.reshape(4, H, H + d_i)                # (gate, out, in)
        Wh_t = jnp.transpose(Wg[:, :, :H], (0, 2, 1))     # (4, H_in,  H_out)
        Wx_t = jnp.transpose(Wg[:, :, H:], (0, 2, 1))     # (4, d_i,   H_out)
        if d_i < dmax:
            Wx_t = jnp.pad(Wx_t, ((0, 0), (0, dmax - d_i), (0, 0)))
        wh_l.append(Wh_t)
        wx_l.append(Wx_t)
        b_l.append(p["b"].reshape(4, 1, H))
        lnw_l.append(jnp.repeat(p["lnw"], B, axis=0))     # (4B, H): gate-major rows
        lnb_l.append(jnp.repeat(p["lnb"], B, axis=0))
    return {
        "wh": jnp.stack(wh_l).astype(jnp.bfloat16),       # (L, 4, H, H)
        "wx": jnp.stack(wx_l).astype(jnp.bfloat16),       # (L, 4, Dmax, H)
        "b": jnp.stack(b_l),                              # (L, 4, 1, H) f32
        "lnw": jnp.stack(lnw_l),                          # (L, 4B, H) f32
        "lnb": jnp.stack(lnb_l),                          # (L, 4B, H) f32
    }


# ---------------------------------------------------------------------------
# Pure-JAX reference (same math, same bf16 matmul inputs / f32 accumulation)
# ---------------------------------------------------------------------------
def lstm_cell_forward_ref(params, x, hn, cn):
    def ln(g, w, b):
        mu = jnp.mean(g, axis=-1, keepdims=True)
        var = jnp.mean((g - mu) ** 2, axis=-1, keepdims=True)
        return (g - mu) * jax.lax.rsqrt(var + LN_EPS) * w[None, :] + b[None, :]

    houts, couts = [], []
    for i, p in enumerate(params):
        hx, cx = hn[i], cn[i]
        H = hx.shape[1]
        W = p["W"]
        Wh_t = W[:, :H].T.astype(jnp.bfloat16)       # (H,   4H)
        Wx_t = W[:, H:].T.astype(jnp.bfloat16)       # (d_i, 4H)
        gates = (jnp.dot(hx.astype(jnp.bfloat16), Wh_t, preferred_element_type=jnp.float32)
                 + jnp.dot(x.astype(jnp.bfloat16), Wx_t, preferred_element_type=jnp.float32)
                 + p["b"][None, :])
        ig_n = ln(gates[:, 0 * H:1 * H], p["lnw"][0], p["lnb"][0])
        fg_n = ln(gates[:, 1 * H:2 * H], p["lnw"][1], p["lnb"][1])
        cg_n = ln(gates[:, 2 * H:3 * H], p["lnw"][2], p["lnb"][2])
        og_n = ln(gates[:, 3 * H:4 * H], p["lnw"][3], p["lnb"][3])
        ig, fg = jax.nn.sigmoid(ig_n), jax.nn.sigmoid(fg_n)
        cg2, og = jnp.tanh(cg_n), jax.nn.sigmoid(og_n)
        c = cx * fg + ig * cg2
        x = og * jnp.tanh(c) + cg_n
        houts.append(x)
        couts.append(c)
    return jnp.stack(houts, axis=0), jnp.stack(couts, axis=0)


if __name__ == "__main__":
    input_size, hidden_size, layer_num, batch = 32, 32, 3, 8

    key = jax.random.PRNGKey(0)
    kp, kx, kh, kc = jax.random.split(key, 4)

    params = init_params(kp, input_size, hidden_size, layer_num)
    x = jax.random.normal(kx, (batch, input_size), jnp.float32)
    hn = jax.random.normal(kh, (layer_num, batch, hidden_size), jnp.float32)
    cn = jax.random.normal(kc, (layer_num, batch, hidden_size), jnp.float32)

    prep = prepare_params(params, input_size, hidden_size, batch)
    forward = jax.jit(lstm_cell_forward)

    h_out, c_out = forward(prep, x, hn, cn)
    jax.block_until_ready((h_out, c_out))

    h_ref, c_ref = lstm_cell_forward_ref(params, x, hn, cn)
    assert h_out.shape == (layer_num, batch, hidden_size)
    assert c_out.shape == (layer_num, batch, hidden_size)
    assert jnp.allclose(h_out, h_ref, atol=2e-5, rtol=2e-5), \
        float(jnp.max(jnp.abs(h_out - h_ref)))
    assert jnp.allclose(c_out, c_ref, atol=2e-5, rtol=2e-5), \
        float(jnp.max(jnp.abs(c_out - c_ref)))

    # TODO(synk): for production H (multiple of 128) add an N-axis grid over 4H with
    # double-buffered bf16 weight tiles (parallel on v7x's 2 TCs) and alias cn->c_out.
    print("KERNEL_OK")
</pallas_src>

<mosaic_0001>
module attributes {stable_mosaic.version = 11 : i64} {
  func.func @_fused_lstm_kernel(%arg0: i32, %arg1: memref<8x32xf32, #tpu.memory_space<vmem>>, %arg2: memref<1x8x32xf32, #tpu.memory_space<vmem>>, %arg3: memref<1x8x32xf32, #tpu.memory_space<vmem>>, %arg4: memref<1x4x32x32xbf16, #tpu.memory_space<vmem>>, %arg5: memref<1x4x32x32xbf16, #tpu.memory_space<vmem>>, %arg6: memref<1x4x1x32xf32, #tpu.memory_space<vmem>>, %arg7: memref<1x32x32xf32, #tpu.memory_space<vmem>>, %arg8: memref<1x32x32xf32, #tpu.memory_space<vmem>>, %arg9: memref<1x8x32xf32, #tpu.memory_space<vmem>>, %arg10: memref<1x8x32xf32, #tpu.memory_space<vmem>>, %arg11: memref<8x32xf32, #tpu.memory_space<vmem>>) attributes {dimension_semantics = [#tpu.dimension_semantics<arbitrary>], iteration_bounds = array<i64: 3>, scalar_prefetch = 0 : i64, scratch_operands = 1 : i64, tpu.core_type = #tpu.core_type<tc>, window_params = [{pipeline_mode = #tpu.pipeline_mode<synchronous>, transform_indices = @transform_0, window_bounds = array<i64: 8, 32>}, {transform_indices = @transform_1, window_bounds = array<i64: 1, 8, 32>}, {transform_indices = @transform_2, window_bounds = array<i64: 1, 8, 32>}, {transform_indices = @transform_3, window_bounds = array<i64: 1, 4, 32, 32>}, {transform_indices = @transform_4, window_bounds = array<i64: 1, 4, 32, 32>}, {transform_indices = @transform_5, window_bounds = array<i64: 1, 4, 1, 32>}, {transform_indices = @transform_6, window_bounds = array<i64: 1, 32, 32>}, {transform_indices = @transform_7, window_bounds = array<i64: 1, 32, 32>}, {transform_indices = @transform_8, window_bounds = array<i64: 1, 8, 32>}, {transform_indices = @transform_9, window_bounds = array<i64: 1, 8, 32>}]} {
    %c0_i32 = arith.constant 0 : i32
    %0 = arith.cmpi eq, %arg0, %c0_i32 : i32
    %1 = arith.extui %0 : i1 to i32
    %c0_i32_0 = arith.constant 0 : i32
    %2 = arith.cmpi ne, %1, %c0_i32_0 : i32
    scf.if %2 {
      %c0_81 = arith.constant 0 : index
      %c0_82 = arith.constant 0 : index
      %113 = vector.load %arg1[%c0_81, %c0_82] : memref<8x32xf32, #tpu.memory_space<vmem>>, vector<8x32xf32>
      %c0_83 = arith.constant 0 : index
      %c0_84 = arith.constant 0 : index
      %114 = vector.load %arg11[%c0_83, %c0_84] : memref<8x32xf32, #tpu.memory_space<vmem>>, vector<8x32xf32>
      tpu.vector_store %arg11[%c0_83, %c0_84], %113 {strides = array<i32>} : memref<8x32xf32, #tpu.memory_space<vmem>>, vector<8x32xf32>,
    } else {
    }
    %c0 = arith.constant 0 : index
    %c0_1 = arith.constant 0 : index
    %c0_2 = arith.constant 0 : index
    %3 = vector.load %arg2[%c0, %c0_1, %c0_2] : memref<1x8x32xf32, #tpu.memory_space<vmem>>, vector<1x8x32xf32>
    %4 = vector.shape_cast %3 : vector<1x8x32xf32> to vector<8x32xf32>
    %c0_3 = arith.constant 0 : index
    %c0_4 = arith.constant 0 : index
    %c0_5 = arith.constant 0 : index
    %5 = vector.load %arg3[%c0_3, %c0_4, %c0_5] : memref<1x8x32xf32, #tpu.memory_space<vmem>>, vector<1x8x32xf32>
    %6 = vector.shape_cast %5 : vector<1x8x32xf32> to vector<8x32xf32>
    %c0_6 = arith.constant 0 : index
    %c0_7 = arith.constant 0 : index
    %7 = vector.load %arg11[%c0_6, %c0_7] : memref<8x32xf32, #tpu.memory_space<vmem>>, vector<8x32xf32>
    %8 = arith.truncf %4 : vector<8x32xf32> to vector<8x32xbf16>
    %9 = arith.truncf %7 : vector<8x32xf32> to vector<8x32xbf16>
    %c0_8 = arith.constant 0 : index
    %c0_9 = arith.constant 0 : index
    %c0_10 = arith.constant 0 : index
    %c0_11 = arith.constant 0 : index
    %10 = vector.load %arg4[%c0_8, %c0_9, %c0_10, %c0_11] : memref<1x4x32x32xbf16, #tpu.memory_space<vmem>>, vector<1x1x32x32xbf16>
    %11 = vector.shape_cast %10 : vector<1x1x32x32xbf16> to vector<32x32xbf16>
    %cst = arith.constant dense<0.000000e+00> : vector<8x32xf32>
    %12 = tpu.matmul %8, %11, %cst {dimension_numbers = #tpu.dot_dimension_numbers<[1], [0], [0], [1], [0, 0, 1, 1], [], []>} : vector<8x32xbf16>, vector<32x32xbf16>, vector<8x32xf32> -> vector<8x32xf32>
    %c0_12 = arith.constant 0 : index
    %c0_13 = arith.constant 0 : index
    %c0_14 = arith.constant 0 : index
    %c0_15 = arith.constant 0 : index
    %13 = vector.load %arg5[%c0_12, %c0_13, %c0_14, %c0_15] : memref<1x4x32x32xbf16, #tpu.memory_space<vmem>>, vector<1x1x32x32xbf16>
    %14 = vector.shape_cast %13 : vector<1x1x32x32xbf16> to vector<32x32xbf16>
    %cst_16 = arith.constant dense<0.000000e+00> : vector<8x32xf32>
    %15 = tpu.matmul %9, %14, %cst_16 {dimension_numbers = #tpu.dot_dimension_numbers<[1], [0], [0], [1], [0, 0, 1, 1], [], []>} : vector<8x32xbf16>, vector<32x32xbf16>, vector<8x32xf32> -> vector<8x32xf32>
    %16 = arith.addf %12, %15 : vector<8x32xf32>
    %c0_17 = arith.constant 0 : index
    %c0_18 = arith.constant 0 : index
    %c0_19 = arith.constant 0 : index
    %c0_20 = arith.constant 0 : index
    %17 = vector.load %arg6[%c0_17, %c0_18, %c0_19, %c0_20] : memref<1x4x1x32xf32, #tpu.memory_space<vmem>>, vector<1x1x1x32xf32>
    %18 = vector.shape_cast %17 : vector<1x1x1x32xf32> to vector<1x32xf32>
    %19 = vector.broadcast %18 : vector<1x32xf32> to vector<8x32xf32>
    %20 = arith.addf %16, %19 : vector<8x32xf32>
    %c0_21 = arith.constant 0 : index
    %c1 = arith.constant 1 : index
    %c0_22 = arith.constant 0 : index
    %c0_23 = arith.constant 0 : index
    %21 = vector.load %arg4[%c0_21, %c1, %c0_22, %c0_23] : memref<1x4x32x32xbf16, #tpu.memory_space<vmem>>, vector<1x1x32x32xbf16>
    %22 = vector.shape_cast %21 : vector<1x1x32x32xbf16> to vector<32x32xbf16>
    %cst_24 = arith.constant dense<0.000000e+00> : vector<8x32xf32>
    %23 = tpu.matmul %8, %22, %cst_24 {dimension_numbers = #tpu.dot_dimension_numbers<[1], [0], [0], [1], [0, 0, 1, 1], [], []>} : vector<8x32xbf16>, vector<32x32xbf16>, vector<8x32xf32> -> vector<8x32xf32>
    %c0_25 = arith.constant 0 : index
    %c1_26 = arith.constant 1 : index
    %c0_27 = arith.constant 0 : index
    %c0_28 = arith.constant 0 : index
    %24 = vector.load %arg5[%c0_25, %c1_26, %c0_27, %c0_28] : memref<1x4x32x32xbf16, #tpu.memory_space<vmem>>, vector<1x1x32x32xbf16>
    %25 = vector.shape_cast %24 : vector<1x1x32x32xbf16> to vector<32x32xbf16>
    %cst_29 = arith.constant dense<0.000000e+00> : vector<8x32xf32>
    %26 = tpu.matmul %9, %25, %cst_29 {dimension_numbers = #tpu.dot_dimension_numbers<[1], [0], [0], [1], [0, 0, 1, 1], [], []>} : vector<8x32xbf16>, vector<32x32xbf16>, vector<8x32xf32> -> vector<8x32xf32>
    %27 = arith.addf %23, %26 : vector<8x32xf32>
    %c0_30 = arith.constant 0 : index
    %c1_31 = arith.constant 1 : index
    %c0_32 = arith.constant 0 : index
    %c0_33 = arith.constant 0 : index
    %28 = vector.load %arg6[%c0_30, %c1_31, %c0_32, %c0_33] : memref<1x4x1x32xf32, #tpu.memory_space<vmem>>, vector<1x1x1x32xf32>
    %29 = vector.shape_cast %28 : vector<1x1x1x32xf32> to vector<1x32xf32>
    %30 = vector.broadcast %29 : vector<1x32xf32> to vector<8x32xf32>
    %31 = arith.addf %27, %30 : vector<8x32xf32>
    %c0_34 = arith.constant 0 : index
    %c2 = arith.constant 2 : index
    %c0_35 = arith.constant 0 : index
    %c0_36 = arith.constant 0 : index
    %32 = vector.load %arg4[%c0_34, %c2, %c0_35, %c0_36] : memref<1x4x32x32xbf16, #tpu.memory_space<vmem>>, vector<1x1x32x32xbf16>
    %33 = vector.shape_cast %32 : vector<1x1x32x32xbf16> to vector<32x32xbf16>
    %cst_37 = arith.constant dense<0.000000e+00> : vector<8x32xf32>
    %34 = tpu.matmul %8, %33, %cst_37 {dimension_numbers = #tpu.dot_dimension_numbers<[1], [0], [0], [1], [0, 0, 1, 1], [], []>} : vector<8x32xbf16>, vector<32x32xbf16>, vector<8x32xf32> -> vector<8x32xf32>
    %c0_38 = arith.constant 0 : index
    %c2_39 = arith.constant 2 : index
    %c0_40 = arith.constant 0 : index
    %c0_41 = arith.constant 0 : index
    %35 = vector.load %arg5[%c0_38, %c2_39, %c0_40, %c0_41] : memref<1x4x32x32xbf16, #tpu.memory_space<vmem>>, vector<1x1x32x32xbf16>
    %36 = vector.shape_cast %35 : vector<1x1x32x32xbf16> to vector<32x32xbf16>
    %cst_42 = arith.constant dense<0.000000e+00> : vector<8x32xf32>
    %37 = tpu.matmul %9, %36, %cst_42 {dimension_numbers = #tpu.dot_dimension_numbers<[1], [0], [0], [1], [0, 0, 1, 1], [], []>} : vector<8x32xbf16>, vector<32x32xbf16>, vector<8x32xf32> -> vector<8x32xf32>
    %38 = arith.addf %34, %37 : vector<8x32xf32>
    %c0_43 = arith.constant 0 : index
    %c2_44 = arith.constant 2 : index
    %c0_45 = arith.constant 0 : index
    %c0_46 = arith.constant 0 : index
    %39 = vector.load %arg6[%c0_43, %c2_44, %c0_45, %c0_46] : memref<1x4x1x32xf32, #tpu.memory_space<vmem>>, vector<1x1x1x32xf32>
    %40 = vector.shape_cast %39 : vector<1x1x1x32xf32> to vector<1x32xf32>
    %41 = vector.broadcast %40 : vector<1x32xf32> to vector<8x32xf32>
    %42 = arith.addf %38, %41 : vector<8x32xf32>
    %c0_47 = arith.constant 0 : index
    %c3 = arith.constant 3 : index
    %c0_48 = arith.constant 0 : index
    %c0_49 = arith.constant 0 : index
    %43 = vector.load %arg4[%c0_47, %c3, %c0_48, %c0_49] : memref<1x4x32x32xbf16, #tpu.memory_space<vmem>>, vector<1x1x32x32xbf16>
    %44 = vector.shape_cast %43 : vector<1x1x32x32xbf16> to vector<32x32xbf16>
    %cst_50 = arith.constant dense<0.000000e+00> : vector<8x32xf32>
    %45 = tpu.matmul %8, %44, %cst_50 {dimension_numbers = #tpu.dot_dimension_numbers<[1], [0], [0], [1], [0, 0, 1, 1], [], []>} : vector<8x32xbf16>, vector<32x32xbf16>, vector<8x32xf32> -> vector<8x32xf32>
    %c0_51 = arith.constant 0 : index
    %c3_52 = arith.constant 3 : index
    %c0_53 = arith.constant 0 : index
    %c0_54 = arith.constant 0 : index
    %46 = vector.load %arg5[%c0_51, %c3_52, %c0_53, %c0_54] : memref<1x4x32x32xbf16, #tpu.memory_space<vmem>>, vector<1x1x32x32xbf16>
    %47 = vector.shape_cast %46 : vector<1x1x32x32xbf16> to vector<32x32xbf16>
    %cst_55 = arith.constant dense<0.000000e+00> : vector<8x32xf32>
    %48 = tpu.matmul %9, %47, %cst_55 {dimension_numbers = #tpu.dot_dimension_numbers<[1], [0], [0], [1], [0, 0, 1, 1], [], []>} : vector<8x32xbf16>, vector<32x32xbf16>, vector<8x32xf32> -> vector<8x32xf32>
    %49 = arith.addf %45, %48 : vector<8x32xf32>
    %c0_56 = arith.constant 0 : index
    %c3_57 = arith.constant 3 : index
    %c0_58 = arith.constant 0 : index
    %c0_59 = arith.constant 0 : index
    %50 = vector.load %arg6[%c0_56, %c3_57, %c0_58, %c0_59] : memref<1x4x1x32xf32, #tpu.memory_space<vmem>>, vector<1x1x1x32xf32>
    %51 = vector.shape_cast %50 : vector<1x1x1x32xf32> to vector<1x32xf32>
    %52 = vector.broadcast %51 : vector<1x32xf32> to vector<8x32xf32>
    %53 = arith.addf %49, %52 : vector<8x32xf32>
    %54 = tpu.concatenate %20, %31, %42, %53 in 0 : vector<8x32xf32>, vector<8x32xf32>, vector<8x32xf32>, vector<8x32xf32> -> vector<32x32xf32>
    %cst_60 = arith.constant dense<0.000000e+00> : vector<32xf32>
    %55 = vector.multi_reduction <add>, %54, %cst_60 [1] : vector<32x32xf32> to vector<32xf32>
    %56 = vector.shape_cast %55 : vector<32xf32> to vector<32x1xf32>
    %cst_61 = arith.constant 3.200000e+01 : f32
    %57 = vector.broadcast %cst_61 : f32 to vector<32x1xf32>
    %58 = arith.divf %56, %57 : vector<32x1xf32>
    %59 = vector.broadcast %58 : vector<32x1xf32> to vector<32x32xf32>
    %60 = arith.subf %54, %59 : vector<32x32xf32>
    %61 = arith.mulf %60, %60 : vector<32x32xf32>
    %cst_62 = arith.constant dense<0.000000e+00> : vector<32xf32>
    %62 = vector.multi_reduction <add>, %61, %cst_62 [1] : vector<32x32xf32> to vector<32xf32>
    %63 = vector.shape_cast %62 : vector<32xf32> to vector<32x1xf32>
    %cst_63 = arith.constant 3.200000e+01 : f32
    %64 = vector.broadcast %cst_63 : f32 to vector<32x1xf32>
    %65 = arith.divf %63, %64 : vector<32x1xf32>
    %cst_64 = arith.constant 9.99999974E-6 : f32
    %66 = vector.broadcast %cst_64 : f32 to vector<32x1xf32>
    %67 = arith.addf %65, %66 : vector<32x1xf32>
    %68 = math.rsqrt %67 : vector<32x1xf32>
    %69 = vector.broadcast %68 : vector<32x1xf32> to vector<32x32xf32>
    %70 = arith.mulf %60, %69 : vector<32x32xf32>
    %c0_65 = arith.constant 0 : index
    %c0_66 = arith.constant 0 : index
    %c0_67 = arith.constant 0 : index
    %71 = vector.load %arg7[%c0_65, %c0_66, %c0_67] : memref<1x32x32xf32, #tpu.memory_space<vmem>>, vector<1x32x32xf32>
    %72 = vector.shape_cast %71 : vector<1x32x32xf32> to vector<32x32xf32>
    %73 = arith.mulf %70, %72 : vector<32x32xf32>
    %c0_68 = arith.constant 0 : index
    %c0_69 = arith.constant 0 : index
    %c0_70 = arith.constant 0 : index
    %74 = vector.load %arg8[%c0_68, %c0_69, %c0_70] : memref<1x32x32xf32, #tpu.memory_space<vmem>>, vector<1x32x32xf32>
    %75 = vector.shape_cast %74 : vector<1x32x32xf32> to vector<32x32xf32>
    %76 = arith.addf %73, %75 : vector<32x32xf32>
    %77 = vector.extract_strided_slice %76 {offsets = [0, 0], sizes = [8, 32], strides = [1, 1]} : vector<32x32xf32> to vector<8x32xf32>
    %78 = vector.extract_strided_slice %76 {offsets = [8, 0], sizes = [8, 32], strides = [1, 1]} : vector<32x32xf32> to vector<8x32xf32>
    %79 = vector.extract_strided_slice %76 {offsets = [16, 0], sizes = [8, 32], strides = [1, 1]} : vector<32x32xf32> to vector<8x32xf32>
    %80 = vector.extract_strided_slice %76 {offsets = [24, 0], sizes = [8, 32], strides = [1, 1]} : vector<32x32xf32> to vector<8x32xf32>
    %81 = arith.negf %77 : vector<8x32xf32>
    %82 = math.exp %81 : vector<8x32xf32>
    %cst_71 = arith.constant 1.000000e+00 : f32
    %83 = vector.broadcast %cst_71 : f32 to vector<8x32xf32>
    %84 = arith.addf %83, %82 : vector<8x32xf32>
    %85 = arith.divf %83, %84 : vector<8x32xf32>
    %86 = arith.negf %78 : vector<8x32xf32>
    %87 = math.exp %86 : vector<8x32xf32>
    %cst_72 = arith.constant 1.000000e+00 : f32
    %88 = vector.broadcast %cst_72 : f32 to vector<8x32xf32>
    %89 = arith.addf %88, %87 : vector<8x32xf32>
    %90 = arith.divf %88, %89 : vector<8x32xf32>
    %91 = arith.negf %80 : vector<8x32xf32>
    %92 = math.exp %91 : vector<8x32xf32>
    %cst_73 = arith.constant 1.000000e+00 : f32
    %93 = vector.broadcast %cst_73 : f32 to vector<8x32xf32>
    %94 = arith.addf %93, %92 : vector<8x32xf32>
    %95 = arith.divf %93, %94 : vector<8x32xf32>
    %96 = math.tanh %79 : vector<8x32xf32>
    %97 = arith.mulf %6, %90 : vector<8x32xf32>
    %98 = arith.mulf %85, %96 : vector<8x32xf32>
    %99 = arith.addf %97, %98 : vector<8x32xf32>
    %100 = math.tanh %99 : vector<8x32xf32>
    %101 = arith.mulf %95, %100 : vector<8x32xf32>
    %102 = arith.addf %101, %79 : vector<8x32xf32>
    %c0_74 = arith.constant 0 : index
    %c0_75 = arith.constant 0 : index
    %c0_76 = arith.constant 0 : index
    %103 = vector.load %arg9[%c0_74, %c0_75, %c0_76] : memref<1x8x32xf32, #tpu.memory_space<vmem>>, vector<1x8x32xf32>
    %104 = vector.shape_cast %103 : vector<1x8x32xf32> to vector<8x32xf32>
    %105 = vector.shape_cast %102 : vector<8x32xf32> to vector<1x8x32xf32>
    tpu.vector_store %arg9[%c0_74, %c0_75, %c0_76], %105 {strides = array<i32>} : memref<1x8x32xf32, #tpu.memory_space<vmem>>, vector<1x8x32xf32>,
    %c0_77 = arith.constant 0 : index
    %c0_78 = arith.constant 0 : index
    %c0_79 = arith.constant 0 : index
    %106 = vector.load %arg10[%c0_77, %c0_78, %c0_79] : memref<1x8x32xf32, #tpu.memory_space<vmem>>, vector<1x8x32xf32>
    %107 = vector.shape_cast %106 : vector<1x8x32xf32> to vector<8x32xf32>
    %108 = vector.shape_cast %99 : vector<8x32xf32> to vector<1x8x32xf32>
    tpu.vector_store %arg10[%c0_77, %c0_78, %c0_79], %108 {strides = array<i32>} : memref<1x8x32xf32, #tpu.memory_space<vmem>>, vector<1x8x32xf32>,
    %c1_i32 = arith.constant 1 : i32
    %109 = arith.addi %arg0, %c1_i32 : i32
    %c3_i32 = arith.constant 3 : i32
    %110 = arith.cmpi slt, %109, %c3_i32 : i32
    %111 = arith.extui %110 : i1 to i32
    %c0_i32_80 = arith.constant 0 : i32
    %112 = arith.cmpi ne, %111, %c0_i32_80 : i32
    scf.if %112 {
      %c0_81 = arith.constant 0 : index
      %c0_82 = arith.constant 0 : index
      %113 = vector.load %arg11[%c0_81, %c0_82] : memref<8x32xf32, #tpu.memory_space<vmem>>, vector<8x32xf32>
      tpu.vector_store %arg11[%c0_81, %c0_82], %102 {strides = array<i32>} : memref<8x32xf32, #tpu.memory_space<vmem>>, vector<8x32xf32>,
    } else {
    }
    return
  }
  func.func @transform_0(%arg0: i32) -> (i32, i32) {
    %c0_i32 = arith.constant 0 : i32
    %c0_i32_0 = arith.constant 0 : i32
    %c0_i32_1 = arith.constant 0 : i32
    return %c0_i32, %c0_i32_0 : i32, i32
  }
  func.func @transform_1(%arg0: i32) -> (i32, i32, i32) {
    %c0_i32 = arith.constant 0 : i32
    %c0_i32_0 = arith.constant 0 : i32
    %c0_i32_1 = arith.constant 0 : i32
    return %arg0, %c0_i32, %c0_i32_0 : i32, i32, i32
  }
  func.func @transform_2(%arg0: i32) -> (i32, i32, i32) {
    %c0_i32 = arith.constant 0 : i32
    %c0_i32_0 = arith.constant 0 : i32
    %c0_i32_1 = arith.constant 0 : i32
    return %arg0, %c0_i32, %c0_i32_0 : i32, i32, i32
  }
  func.func @transform_3(%arg0: i32) -> (i32, i32, i32, i32) {
    %c0_i32 = arith.constant 0 : i32
    %c0_i32_0 = arith.constant 0 : i32
    %c0_i32_1 = arith.constant 0 : i32
    %c0_i32_2 = arith.constant 0 : i32
    return %arg0, %c0_i32, %c0_i32_0, %c0_i32_1 : i32, i32, i32, i32
  }
  func.func @transform_4(%arg0: i32) -> (i32, i32, i32, i32) {
    %c0_i32 = arith.constant 0 : i32
    %c0_i32_0 = arith.constant 0 : i32
    %c0_i32_1 = arith.constant 0 : i32
    %c0_i32_2 = arith.constant 0 : i32
    return %arg0, %c0_i32, %c0_i32_0, %c0_i32_1 : i32, i32, i32, i32
  }
  func.func @transform_5(%arg0: i32) -> (i32, i32, i32, i32) {
    %c0_i32 = arith.constant 0 : i32
    %c0_i32_0 = arith.constant 0 : i32
    %c0_i32_1 = arith.constant 0 : i32
    %c0_i32_2 = arith.constant 0 : i32
    return %arg0, %c0_i32, %c0_i32_0, %c0_i32_1 : i32, i32, i32, i32
  }
  func.func @transform_6(%arg0: i32) -> (i32, i32, i32) {
    %c0_i32 = arith.constant 0 : i32
    %c0_i32_0 = arith.constant 0 : i32
    %c0_i32_1 = arith.constant 0 : i32
    return %arg0, %c0_i32, %c0_i32_0 : i32, i32, i32
  }
  func.func @transform_7(%arg0: i32) -> (i32, i32, i32) {
    %c0_i32 = arith.constant 0 : i32
    %c0_i32_0 = arith.constant 0 : i32
    %c0_i32_1 = arith.constant 0 : i32
    return %arg0, %c0_i32, %c0_i32_0 : i32, i32, i32
  }
  func.func @transform_8(%arg0: i32) -> (i32, i32, i32) {
    %c0_i32 = arith.constant 0 : i32
    %c0_i32_0 = arith.constant 0 : i32
    %c0_i32_1 = arith.constant 0 : i32
    return %arg0, %c0_i32, %c0_i32_0 : i32, i32, i32
  }
  func.func @transform_9(%arg0: i32) -> (i32, i32, i32) {
    %c0_i32 = arith.constant 0 : i32
    %c0_i32_0 = arith.constant 0 : i32
    %c0_i32_1 = arith.constant 0 : i32
    return %arg0, %c0_i32, %c0_i32_0 : i32, i32, i32
  }
}

</mosaic_0001>

<bundles_post_ra>
// kernel: lstm_cell_forward.1
= control target key start
LH: loop header
LB: loop body
LE: loop exit
PB: predicated region body
PF: predicated region fallthrough
CT: control target
= control target key end

     0   :  { %s2712_s0 = inlined_call_operand.hbm [shape: f32[8,32], index: 0, kind: input, shape index: {}]   ;;  %s2713_s1 = inlined_call_operand.hbm [shape: f32[3,8,32], index: 1, kind: input, shape index: {}]   ;;  %s2714_s2 = inlined_call_operand.vmem [shape: f32[3,8,32], index: 2, kind: input, shape index: {}]   ;;  %s2715_s3 = inlined_call_operand.hbm [shape: bf16[3,4,32,32], index: 3, kind: input, shape index: {}]   ;;  %s2716_s4 = inlined_call_operand.hbm [shape: bf16[3,4,32,32], index: 4, kind: input, shape index: {}]   ;;  %s2717_s5 = inlined_call_operand.hbm [shape: f32[3,4,1,32], index: 5, kind: input, shape index: {}]   ;;  %s2718_s6 = inlined_call_operand.hbm [shape: f32[3,32,32], index: 6, kind: input, shape index: {}]   ;;  %s2719_s7 = inlined_call_operand.hbm [shape: f32[3,32,32], index: 7, kind: input, shape index: {}]   ;;  %s2720_s8 = inlined_call_operand.hbm [shape: f32[3,8,32], index: 8, kind: output, shape index: {0}]   ;;  %s2721_s9 = inlined_call_operand.hbm [shape: f32[3,8,32], index: 9, kind: output, shape index: {1}]  }
   0x1   :  { %2745 = sst [smem:[#allocation29_spill]] %s2713_s1 }
   0x2   :  { %2746 = sst [smem:[#allocation30_spill]] %s2715_s3 }
   0x3   :  { %2747 = sst [smem:[#allocation31_spill]] %s2716_s4 }
   0x4   :  { %2748 = sst [smem:[#allocation32_spill]] %s2718_s6 }
   0x5   :  { %2749 = sst [smem:[#allocation33_spill]] %s2721_s9 }
   0x6   :  { %15 = vsyncpa [#allocation4], 0 }
   0x7   :  { %16 = vsyncpa [#allocation7], 0 }
   0x8   :  { %18 = vsyncpa [#allocation7 + $0x1], 0 }
   0x9   :  { %19 = vsyncpa [#allocation10], 0 }
   0xa   :  { %21 = vsyncpa [#allocation10 + $0x1], 0 }
   0xb   :  { %22 = vsyncpa [#allocation13], 0 }
   0xc   :  { %24 = vsyncpa [#allocation13 + $0x1], 0 }
   0xd   :  { %25 = vsyncpa [#allocation5], 0 }
   0xe   :  { %27 = vsyncpa [#allocation5 + $0x1], 0 }
   0xf   :  { %28 = vsyncpa [#allocation17], 0 }
  0x10   :  { %30 = vsyncpa [#allocation17 + $0x1], 0  ;;  %s2168_s30 = smov 0   ;;  %s2170_s10 = smov 0  }
  0x11   :  { %s2172_s11 = smov 0   ;;  %s2174_s12 = smov 0  }
  0x12 LB: > { %2750 = sst [smem:[#allocation24_spill]] %s2087_s30  ;;  %s2189_s13 = sadd.s32 1, %s2099_s12   ;;  %s2099_s12 = sphi %s2174_s12, %s2790_s12   ;;  %s2095_s11 = sphi %s2172_s11, %s2792_s11   ;;  %s2091_s10 = sphi %s2170_s10, %s2794_s10   ;;  %s2087_s30 = sphi %s2168_s30, %s2793_s30  }
  0x13   : > { %2751 = sst [smem:[#allocation25_spill]] %s2095_s11  ;;  %s64_s14 = sadd.s32 1, %s2095_s11 }
  0x14   : > { %2752 = sst [smem:[#allocation26_spill]] %s2189_s13  ;;  %s61_s15 = ssub.s32 %s2099_s12, %s2189_s13 }
  0x15   : > { %p2722_p0 = scmp.ne.s32.totalorder %s2095_s11, %s2091_s10  ;;  %p62_p1 = scmp.eq.s32.totalorder %s61_s15, 0 }
  0x16   : > { %p72_p2 = scmp.eq.s32.totalorder %s2099_s12, 0  ;;  %p1697_p3 = scmp.lt.s32.totalorder %s2099_s12, 3 }
  0x17   : > { %s2199_s16 = scalar_select %p62_p1, %s2095_s11, %s64_s14  }
  0x18   : > { %p73_p4 = por %p72_p2, %p2722_p0  ;;  %s2205_s17 = sand.u32 1, %s2099_s12  }
  0x19   : > { %2753 = sst [smem:[#allocation27_spill]] %s2199_s16  ;;  %s2208_s18 = sand.u32 1, %s2095_s11  }
  0x1a   : > { %s1459_s19 = sshll.u32 %s2208_s18, 3  ;;  %s1460_s20 = sshll.u32 %s2099_s12, 7 }
  0x1b   : > { %s2754_s1 = sld [smem:[#allocation29_spill]]  ;;  %s324_s24 = scalar_lea.vmem [#allocation6], %s1459_s19 }
  0x1c   : > { %s331_s25 = sshll.u32 %s324_s24, 4  ;;  %p2217_p5 = pnand %p1697_p3, %p73_p4  ;;  %s2221_s25 = int_to_ptr.vmem [resolvable:$true] %s331_s25 }
  0x1d   : > { %s2723_s28 = scalar_lea.sflag [#allocation7], %s2205_s17 }
  0x1e   : > { %s2755_s26 = scalar_select %p2217_p5, 1, 0 }
  0x1f   : > { %p2229_p7 = pneg %p2217_p5 }
  0x21   : > { %s2215_s23 = scalar_lea.hbm %s2754_s1, %s1460_s20  ;;  %s1786_s20 = scalar_lea.hbm %s2754_s1, 384 }
  0x22   : > { %s1781_s29 = scalar_lea.hbm %s2215_s23, 128  ;;  %p1787_p10 = scmp.lt.u32.totalorder %s2215_s23, %s2754_s1 }
  0x23   : > { %p1782_p6 = scmp.ne.s32.totalorder %s2215_s23, %s1781_s29  ;;  %p1788_p11 = scmp.lt.u32.totalorder %s1786_s20, %s1781_s29 }
  0x24   : > { %s2756_s14 = scalar_select %p2229_p7, 1, 0 }
  0x25   : > { %p1784_p8 = pnand %p2229_p7, %p1782_p6  ;;  %p1789_p12 = por %p1788_p11, %p1787_p10 }
  0x26   : > { %p1790_p13 = scmp.lt.u32.totalorder %s1781_s29, %s2215_s23 }
  0x27   : > { %p1785_p9 = pneg %p1784_p8 }
  0x28   : > { %p1791_p1 = por %p1790_p13, %p1789_p12 }
  0x2a   : > { %p1792_p2 = pnand %p1791_p1, %p1785_p9 }
  0x2c   : > { %1795 = shalt.err (!%p1792_p2)
}
  0x2d   : > { %s1796_s24 = scalar_lea.vmem %s2221_s25, 128  ;;  %s2101_s15 = smov [#allocation6]  }
  0x2e   : > { %p1797_p3 = scmp.ne.s32.totalorder %s2221_s25, %s1796_s24  ;;  %s1801_s19 = sshll.u32 %s2101_s15, 4  ;;  %s1802_s19 = int_to_ptr.vmem [resolvable:$false] %s1801_s19 }
  0x2f   : > { %s1803_s21 = scalar_lea.vmem %s1802_s19, 256  ;;  %p1804_p8 = scmp.lt.s32.totalorder %s2221_s25, %s1802_s19 }
  0x30   : > { %p1799_p4 = pnand %p1797_p3, %p2229_p7  ;;  %p1805_p0 = scmp.lt.s32.totalorder %s1803_s21, %s1796_s24 }
  0x32   : > { %p1800_p6 = pneg %p1799_p4  ;;  %p1806_p10 = por %p1805_p0, %p1804_p8 }
  0x34   : > { %p1807_p11 = pnand %p1806_p10, %p1800_p6 }
  0x36   : > { %1810 = shalt.err (!%p1807_p11)
}
  0x37   : > { %1673 = dma.hbm_to_vmem [thread:$0]  (!%p2217_p5), %s2215_s23, 128, %s2221_s25, %s2723_s28  }
  0x38   : > { %s1461_s29 = sshll.u32 %s2208_s18, 6  ;;  %s1553_s20 = sshll.u32 %s2099_s12, 10 }
  0x39   : > { %s2757_s3 = sld [smem:[#allocation30_spill]]  ;;  %s349_s19 = scalar_lea.vmem [#allocation8], %s1461_s29 }
  0x3a   : > { %s356_s21 = sshll.u32 %s349_s19, 4  ;;  %s2758_s4 = sld [smem:[#allocation31_spill]]  ;;  %s2261_s21 = int_to_ptr.vmem [resolvable:$true] %s356_s21 }
  0x3b   : > { %s370_s23 = scalar_lea.vmem [#allocation9], %s1461_s29  ;;  %s1470_s22 = sshll.u32 %s2208_s18, 5 }
  0x3c   : > { %s377_s25 = sshll.u32 %s370_s23, 4  ;;  %s2727_s15 = scalar_lea.sflag [#allocation10], %s2205_s17  ;;  %s2268_s25 = int_to_ptr.vmem [resolvable:$true] %s377_s25 }
  0x3f   : > { %s2259_s24 = scalar_lea.hbm %s2757_s3, %s1553_s20 }
  0x40   : > { %s2266_s16 = scalar_lea.hbm %s2758_s4, %s1553_s20  ;;  %s1816_s1 = scalar_lea.hbm %s2758_s4, 3072 }
  0x41   : > { %s1811_s28 = scalar_lea.hbm %s2266_s16, 1024  ;;  %p1817_p13 = scmp.lt.u32.totalorder %s2266_s16, %s2758_s4 }
  0x42   : > { %p1812_p0 = scmp.ne.s32.totalorder %s2266_s16, %s1811_s28  ;;  %p1818_p1 = scmp.lt.u32.totalorder %s1816_s1, %s1811_s28 }
  0x43   : > { %p1820_p3 = scmp.lt.u32.totalorder %s1811_s28, %s2266_s16 }
  0x44   : > { %p1814_p9 = pnand %p1812_p0, %p2229_p7  ;;  %p1819_p2 = por %p1818_p1, %p1817_p13 }
  0x46   : > { %p1815_p12 = pneg %p1814_p9  ;;  %p1821_p4 = por %p1820_p3, %p1819_p2 }
  0x48   : > { %p1822_p6 = pnand %p1821_p4, %p1815_p12 }
  0x4a   : > { %1825 = shalt.err (!%p1822_p6)
}
  0x4b   : > { %s1826_s29 = scalar_lea.vmem %s2268_s25, 1024  ;;  %s2102_s13 = smov [#allocation9]  }
  0x4c   : > { %p1827_p8 = scmp.ne.s32.totalorder %s2268_s25, %s1826_s29  ;;  %s1831_s23 = sshll.u32 %s2102_s13, 4  ;;  %s1832_s23 = int_to_ptr.vmem [resolvable:$false] %s1831_s23 }
  0x4d   : > { %s1833_s19 = scalar_lea.vmem %s1832_s23, 2048  ;;  %p1834_p0 = scmp.lt.s32.totalorder %s2268_s25, %s1832_s23 }
  0x4e   : > { %p1829_p10 = pnand %p1827_p8, %p2229_p7  ;;  %p1835_p9 = scmp.lt.s32.totalorder %s1833_s19, %s1826_s29 }
  0x50   : > { %p1830_p11 = pneg %p1829_p10  ;;  %p1836_p13 = por %p1835_p9, %p1834_p0 }
  0x52   : > { %p1837_p1 = pnand %p1836_p13, %p1830_p11 }
  0x54   : > { %1840 = shalt.err (!%p1837_p1)
}
  0x55   : > { %s2728_s28 = smov 64   ;;  %s2729_s1 = smov 4  }
  0x56   : > { %1679 = dma.hbm_to_vmem [thread:$0]  (!%p2217_p5), %s2266_s16, 1024, %s2268_s25, %s2727_s15, %s2728_s28, %s2728_s28, %s2729_s1  }
  0x57   : > { %s1556_s27 = sshll.u32 %s2099_s12, 9  ;;  %s2759_s6 = sld [smem:[#allocation32_spill]] }
  0x58   : > { %s412_s23 = scalar_lea.vmem [#allocation12], %s1470_s22  ;;  %s2730_s4 = scalar_lea.sflag [#allocation13], %s2205_s17 }
  0x59   : > { %s419_s19 = sshll.u32 %s412_s23, 4  ;;  %s2308_s19 = int_to_ptr.vmem [resolvable:$true] %s419_s19 }
  0x5d   : > { %s2304_s13 = scalar_lea.hbm %s2759_s6, %s1556_s27  ;;  %s1846_s20 = scalar_lea.hbm %s2759_s6, 1536 }
  0x5e   : > { %s1841_s9 = scalar_lea.hbm %s2304_s13, 512  ;;  %p1847_p4 = scmp.lt.u32.totalorder %s2304_s13, %s2759_s6 }
  0x5f   : > { %p1842_p12 = scmp.ne.s32.totalorder %s2304_s13, %s1841_s9  ;;  %p1848_p6 = scmp.lt.u32.totalorder %s1846_s20, %s1841_s9 }
  0x60   : > { %p1850_p10 = scmp.lt.u32.totalorder %s1841_s9, %s2304_s13 }
  0x61   : > { %p1844_p2 = pnand %p1842_p12, %p2229_p7  ;;  %p1849_p8 = por %p1848_p6, %p1847_p4 }
  0x63   : > { %p1845_p3 = pneg %p1844_p2  ;;  %p1851_p11 = por %p1850_p10, %p1849_p8 }
  0x65   : > { %p1852_p0 = pnand %p1851_p11, %p1845_p3 }
  0x67   : > { %1855 = shalt.err (!%p1852_p0)
}
  0x68   : > { %s1856_s23 = scalar_lea.vmem %s2308_s19, 512  ;;  %s2105_s16 = smov [#allocation12]  }
  0x69   : > { %p1857_p9 = scmp.ne.s32.totalorder %s2308_s19, %s1856_s23  ;;  %s1861_s25 = sshll.u32 %s2105_s16, 4  ;;  %s1862_s25 = int_to_ptr.vmem [resolvable:$false] %s1861_s25 }
  0x6a   : > { %s1863_s15 = scalar_lea.vmem %s1862_s25, 1024  ;;  %p1864_p12 = scmp.lt.s32.totalorder %s2308_s19, %s1862_s25 }
  0x6b   : > { %p1859_p13 = pnand %p1857_p9, %p2229_p7  ;;  %p1865_p2 = scmp.lt.s32.totalorder %s1863_s15, %s1856_s23 }
  0x6d   : > { %p1860_p1 = pneg %p1859_p13  ;;  %p1866_p4 = por %p1865_p2, %p1864_p12 }
  0x6f   : > { %p1867_p6 = pnand %p1866_p4, %p1860_p1 }
  0x71   : > { %1870 = shalt.err (!%p1867_p6)
}
  0x72   : > { %s2731_s9 = smov 128   ;;  %s2732_s20 = smov 8  }
  0x73   : > { %1685 = dma.hbm_to_vmem [thread:$0]  (!%p2217_p5), %s2304_s13, 512, %s2308_s19, %s2730_s4, %s2731_s9, %s2731_s9, %s2732_s20  }
  0x74   : > { %s2342_s16 = scalar_lea.hbm %s2719_s7, %s1556_s27  ;;  %s433_s25 = scalar_lea.vmem [#allocation14], %s1470_s22 }
  0x75   : > { %s440_s15 = sshll.u32 %s433_s25, 4  ;;  %s2349_s28 = sadd.s32 4294967295, %s2099_s12   ;;  %s2346_s15 = int_to_ptr.vmem [resolvable:$true] %s440_s15 }
  0x76   : > { %s1455_s1 = sadd.s32 4294967294, %s2099_s12   ;;  %p77_p3 = scmp.ne.s32.totalorder %s2091_s10, %s2087_s30 }
  0x77   : > { %p2734_p8 = scmp.eq.s32.totalorder %s2349_s28, 0  ;;  %p257_p10 = scmp.eq.s32.totalorder %s2349_s28, 2 }
  0x78   : > { %p263_p11 = scmp.eq.s32.totalorder %s1455_s1, 2  ;;  %p1456_p0 = scmp.ge.s32.totalorder %s2099_s12, 1 }
  0x79   : > { %p2359_p9 = por %p2734_p8, %p77_p3  ;;  %p2761_p13 = scmp.ne.s32.totalorder %s2095_s11, %s2091_s10 }
  0x7a   : > { %p2370_p12 = por %p263_p11, %p77_p3  ;;  %p296_p2 = scmp.lt.s32.totalorder %s2099_s12, 4 }
  0x7b   : > { %s2760_s22 = scalar_select %p2359_p9, 1, 0 }
  0x7c   : > { %p2366_p1 = por %p257_p10, %p2761_p13  ;;  %p2376_p6 = pnand %p1456_p0, %p296_p2 }
  0x7d   : > { %s2763_s13 = scalar_select %p2370_p12, 1, 0 }
  0x7e   : > { %s2762_s27 = scalar_select %p2366_p1, 1, 0 }
  0x7f   : > { %2764 = sst [smem:[#allocation28_spill]] %s2763_s13  ;;  %s2108_s19 = smov [#allocation3]  }
  0x80   : > { %s2765_s1 = scalar_select %p2376_p6, 1, 0 }
  0x81   : > { %s309_s29 = sshll.u32 %s2108_s19, 4  ;;  %s1555_s23 = sshll.u32 %s2099_s12, 6  ;;  %s2380_s29 = int_to_ptr.vmem [resolvable:$true] %s309_s29 }
  0x82   : > { %s1871_s25 = scalar_lea.hbm %s2259_s24, 1024  ;;  %s1876_s20 = scalar_lea.hbm %s2757_s3, 3072 }
  0x83   : > { %p1872_p3 = scmp.ne.s32.totalorder %s2259_s24, %s1871_s25  ;;  %p1877_p0 = scmp.lt.u32.totalorder %s2259_s24, %s2757_s3 }
  0x84   : > { %p1878_p2 = scmp.lt.u32.totalorder %s1876_s20, %s1871_s25  ;;  %p1880_p8 = scmp.lt.u32.totalorder %s1871_s25, %s2259_s24 }
  0x85   : > { %p1874_p11 = pnand %p1872_p3, %p2229_p7 }
  0x86   : > { %p1879_p4 = por %p1878_p2, %p1877_p0 }
  0x87   : > { %p1875_p13 = pneg %p1874_p11 }
  0x88   : > { %p1881_p12 = por %p1880_p8, %p1879_p4 }
  0x8a   : > { %p1882_p1 = pnand %p1881_p12, %p1875_p13 }
  0x8c   : > { %1885 = shalt.err (!%p1882_p1)
}
  0x8d   : > { %s1886_s19 = scalar_lea.vmem %s2261_s21, 1024  ;;  %s2109_s4 = smov [#allocation8]  }
  0x8e   : > { %p1887_p3 = scmp.ne.s32.totalorder %s2261_s21, %s1886_s19  ;;  %s1891_s9 = sshll.u32 %s2109_s4, 4  ;;  %s1892_s9 = int_to_ptr.vmem [resolvable:$false] %s1891_s9 }
  0x8f   : > { %s1893_s6 = scalar_lea.vmem %s1892_s9, 2048  ;;  %p1894_p9 = scmp.lt.s32.totalorder %s2261_s21, %s1892_s9 }
  0x90   : > { %p1889_p11 = pnand %p1887_p3, %p2229_p7  ;;  %p1895_p6 = scmp.lt.s32.totalorder %s1893_s6, %s1886_s19 }
  0x92   : > { %p1890_p10 = pneg %p1889_p11  ;;  %p1896_p0 = por %p1895_p6, %p1894_p9 }
  0x94   : > { %p1897_p2 = pnand %p1896_p0, %p1890_p10 }
  0x96   : > { %1900 = shalt.err (!%p1897_p2)
}
  0x97   : > { %s2766_s11 = smov 4   ;;  %s2767_s20 = smov 64  }
  0x98   : > { %s2768_s25 = scalar_lea.sflag [#allocation7], %s2205_s17  ;;  %p2769_p8 = scmp.eq.s32.totalorder %s2349_s28, 0 }
  0x99   : > { %1676 = dma.hbm_to_vmem [thread:$0]  (!%p2217_p5), %s2259_s24, 1024, %s2261_s21, %s2768_s25, %s2767_s20, %s2767_s20, %s2766_s11  }
  0x9a   : > { %p2770_p1 = scmp.ne.s32.totalorder %s2765_s1, 0  ;;  %s2425_s6 = scalar_lea.hbm %s2717_s5, %s1555_s23 }
  0x9b   : > { %s2773_s3 = sshll.u32 %s2208_s18, 2  ;;  %s1901_s11 = scalar_lea.hbm %s2712_s0, 128 }
  0x9c   : > { %p2771_p12 = pneg %p2770_p1  ;;  %s391_s13 = scalar_lea.vmem [#allocation11], %s2773_s3 }
  0x9d   : > { %s398_s30 = sshll.u32 %s391_s13, 4  ;;  %p1902_p4 = scmp.ne.s32.totalorder %s2712_s0, %s1901_s11  ;;  %s2429_s30 = int_to_ptr.vmem [resolvable:$true] %s398_s30 }
  0x9e   : > { %p2416_p9 = pnand %p2771_p12, %p2769_p8  ;;  %p1908_p3 = scmp.lt.u32.totalorder %s1901_s11, %s2712_s0 }
  0xa0   : > { %p1903_p6 = pneg %p2416_p9 }
  0xa2   : > { %p1904_p10 = pnand %p1903_p6, %p1902_p4 }
  0xa4   : > { %p1905_p13 = pneg %p1904_p10 }
  0xa6   : > { %p1910_p11 = pnand %p1908_p3, %p1905_p13 }
  0xa8   : > { %1913 = shalt.err (!%p1910_p11)
}
  0xa9   : > { %s1914_s3 = scalar_lea.vmem %s2380_s29, 128  ;;  %p1922_p12 = scmp.lt.s32.totalorder %s2380_s29, %s2380_s29 }
  0xaa   : > { %p1915_p0 = scmp.ne.s32.totalorder %s2380_s29, %s1914_s3  ;;  %p1923_p1 = scmp.lt.s32.totalorder %s1914_s3, %s1914_s3 }
  0xac   : > { %p1917_p2 = pnand %p1915_p0, %p1903_p6  ;;  %p1924_p5 = por %p1923_p1, %p1922_p12 }
  0xae   : > { %p1918_p8 = pneg %p1917_p2 }
  0xb0   : > { %p1925_p7 = pnand %p1924_p5, %p1918_p8 }
  0xb2   : > { %1928 = shalt.err (!%p1925_p7)
}
  0xb3   : > { %1669 = dma.hbm_to_vmem [thread:$0]  (!%p2416_p9), %s2712_s0, 128, %s2380_s29, [#allocation4]  }
  0xb4   : > { %s1929_s9 = scalar_lea.hbm %s2425_s6, 64  ;;  %p2774_p6 = scmp.ne.s32.totalorder %s2756_s14, 0 }
  0xb5   : > { %p1930_p4 = scmp.ne.s32.totalorder %s2425_s6, %s1929_s9  ;;  %s1934_s11 = scalar_lea.hbm %s2717_s5, 192 }
  0xb6   : > { %p1935_p5 = scmp.lt.u32.totalorder %s2425_s6, %s2717_s5  ;;  %p1936_p7 = scmp.lt.u32.totalorder %s1934_s11, %s1929_s9 }
  0xb7   : > { %p1932_p10 = pnand %p1930_p4, %p2774_p6  ;;  %p1938_p3 = scmp.lt.u32.totalorder %s1929_s9, %s2425_s6 }
  0xb8   : > { %p1937_p1 = por %p1936_p7, %p1935_p5 }
  0xb9   : > { %p1933_p13 = pneg %p1932_p10 }
  0xba   : > { %p1939_p11 = por %p1938_p3, %p1937_p1 }
  0xbc   : > { %p1940_p0 = pnand %p1939_p11, %p1933_p13 }
  0xbe   : > { %1943 = shalt.err (!%p1940_p0)
}
  0xbf   : > { %s1944_s29 = scalar_lea.vmem %s2429_s30, 64  ;;  %s2110_s25 = smov [#allocation11]  }
  0xc0   : > { %p1945_p9 = scmp.ne.s32.totalorder %s2429_s30, %s1944_s29  ;;  %s1949_s4 = sshll.u32 %s2110_s25, 4  ;;  %s1950_s4 = int_to_ptr.vmem [resolvable:$false] %s1949_s4 }
  0xc1   : > { %s1951_s23 = scalar_lea.vmem %s1950_s4, 128  ;;  %p1952_p12 = scmp.lt.s32.totalorder %s2429_s30, %s1950_s4 }
  0xc2   : > { %p1947_p2 = pnand %p1945_p9, %p2774_p6  ;;  %p1953_p4 = scmp.lt.s32.totalorder %s1951_s23, %s1944_s29 }
  0xc4   : > { %p1948_p8 = pneg %p1947_p2  ;;  %p1954_p10 = por %p1953_p4, %p1952_p12 }
  0xc6   : > { %p1955_p5 = pnand %p1954_p10, %p1948_p8 }
  0xc8   : > { %1958 = shalt.err (!%p1955_p5)
}
  0xc9   : > { %s2111_s3 = smov 16   ;;  %s2112_s18 = smov 1  }
  0xca   : > { %p2775_p13 = scmp.ne.s32.totalorder %s2755_s26, 0  ;;  %s2776_s13 = scalar_lea.sflag [#allocation10], %s2205_s17 }
  0xcb   : > { %s1959_s9 = scalar_lea.hbm %s2342_s16, 512  ;;  %s1964_s11 = scalar_lea.hbm %s2719_s7, 1536 }
  0xcc   : > { %1682 = dma.hbm_to_vmem [thread:$0]  (!%p2775_p13), %s2425_s6, 64, %s2429_s30, %s2776_s13, %s2111_s3, %s2111_s3, %s2112_s18  }
  0xcd   : > { %p1960_p7 = scmp.ne.s32.totalorder %s2342_s16, %s1959_s9  ;;  %p1965_p11 = scmp.lt.u32.totalorder %s2342_s16, %s2719_s7 }
  0xce   : > { %p1966_p0 = scmp.lt.u32.totalorder %s1964_s11, %s1959_s9  ;;  %p1968_p2 = scmp.lt.u32.totalorder %s1959_s9, %s2342_s16 }
  0xcf   : > { %p1962_p1 = pnand %p1960_p7, %p2774_p6 }
  0xd0   : > { %p1967_p9 = por %p1966_p0, %p1965_p11 }
  0xd1   : > { %p1963_p3 = pneg %p1962_p1 }
  0xd2   : > { %p1969_p8 = por %p1968_p2, %p1967_p9 }
  0xd4   : > { %p1970_p12 = pnand %p1969_p8, %p1963_p3 }
  0xd6   : > { %1973 = shalt.err (!%p1970_p12)
}
  0xd7   : > { %s1974_s30 = scalar_lea.vmem %s2346_s15, 512  ;;  %s2113_s6 = smov [#allocation14]  }
  0xd8   : > { %p1975_p4 = scmp.ne.s32.totalorder %s2346_s15, %s1974_s30  ;;  %s1979_s29 = sshll.u32 %s2113_s6, 4  ;;  %s1980_s29 = int_to_ptr.vmem [resolvable:$false] %s1979_s29 }
  0xd9   : > { %s1981_s25 = scalar_lea.vmem %s1980_s29, 1024  ;;  %p1982_p7 = scmp.lt.s32.totalorder %s2346_s15, %s1980_s29 }
  0xda   : > { %p1977_p10 = pnand %p1975_p4, %p2774_p6  ;;  %p1983_p1 = scmp.lt.s32.totalorder %s1981_s25, %s1974_s30 }
  0xdc   : > { %p1978_p5 = pneg %p1977_p10  ;;  %p1984_p11 = por %p1983_p1, %p1982_p7 }
  0xde   : > { %p1985_p0 = pnand %p1984_p11, %p1978_p5 }
  0xe0   : > { %1988 = shalt.err (!%p1985_p0)
}
  0xe1   : > { %s2777_s4 = smov 8   ;;  %s2778_s23 = smov 128  }
  0xe2   : > { %s2779_s3 = scalar_lea.sflag [#allocation13], %s2205_s17  ;;  %p2780_p6 = scmp.ne.s32.totalorder %s2765_s1, 0 }
  0xe3   : > { %1688 = dma.hbm_to_vmem [thread:$0]  (!%p2775_p13), %s2342_s16, 512, %s2346_s15, %s2779_s3, %s2778_s23, %s2778_s23, %s2777_s4  }
  0xe4   : > { %452 = sbr.rel (%p2780_p6) target bundleno = 903 (0x387), region = 52  ;;  %p2781_p3 = scmp.eq.s32.totalorder (!%p2780_p6), %s2349_s28, 0 }
  0xeb   : > { %2062 = dma.done.wait (%p2781_p3), [#allocation4], 128   ;;  %p2782_p9 = pmov %p2781_p3 }
  0xec   : > { %s458_s26 = sand.u32 1, %s2349_s28   ;;  %s2509_s14 = sand.u32 1, %s2091_s10  }
  0xed   : > { %2064 = vsyncadd (%p2782_p9), [#allocation4], 4294967168  ;;  %s2512_s17 = sshll.u32 %s2509_s14, 3  ;;  %s459_s16 = scalar_lea.sflag [#allocation7], %s458_s26 }
  0xee   : > { %s462_s15 = scalar_lea.vmem [#allocation6], %s2512_s17  ;;  %p2783_p13 = scmp.ne.s32.totalorder %s2760_s22, 0 }
  0xf0   : > { %2066 = dma.done.wait (%p2783_p13), %s459_s16, 1152  }
  0xf1   : > { %2068 = vsyncadd (%p2783_p13), %s459_s16, 4294966144  ;;  %s1479_s1 = sshll.u32 %s2509_s14, 6  ;;  %s477_s13 = scalar_lea.sflag [#allocation10], %s458_s26 }
  0xf2   : > { %s2520_s18 = scalar_lea.vmem [#allocation8], %s1479_s1  ;;  %s2522_s9 = scalar_lea.vmem [#allocation9], %s1479_s1 }
  0xf3   : > { %2070 = dma.done.wait (%p2783_p13), %s477_s13, 1088  }
  0xf4   : > { %2072 = vsyncadd (%p2783_p13), %s477_s13, 4294966208  ;;  %s1481_s24 = sshll.u32 %s2509_s14, 2  ;;  %s1482_s21 = sshll.u32 %s2509_s14, 5 }
  0xf5   : > { %s2530_s11 = scalar_lea.vmem [#allocation11], %s1481_s24  ;;  %s495_s19 = scalar_lea.sflag [#allocation13], %s458_s26 }
  0xf6   : > { %s2532_s20 = scalar_lea.vmem [#allocation12], %s1482_s21 }
  0xf7   : > { %2074 = dma.done.wait (%p2783_p13), %s495_s19, 1024  }
  0xf8   : > { %2076 = vsyncadd (%p2783_p13), %s495_s19, 4294966272  ;;  %p576_p2 = scmp.lt.s32.totalorder %s2349_s28, 2  ;;  %s2545_s23 = scalar_lea.vmem [#allocation14], %s1482_s21 }
  0xf9   : > { %s568_s3 = scalar_lea.vmem [#allocation15], %s2512_s17  ;;  %s575_s26 = scalar_lea.vmem [#allocation16], %s2512_s17 }
  0xfa   : > { %s577_s30 = scalar_select %p576_p2, %s2349_s28, 2 }
  0xfb   : > { %p2784_p8 = scmp.ne.s32.totalorder %s2349_s28, 0 }
  0xfc   : > { %s1486_s6 = sshll.u32 %s577_s30, 3  ;;  %v585_v0 = vld [vmem:[#allocation3] sm:$0xff] (!%p2784_p8)  ;;  %vm586_vm0 = vcmask (!%p2784_p8), 261120  }
  0xfd   : > { %s2543_s4 = scalar_lea.vmem %s2714_s2, %s1486_s6  ;;  %584 = sbr.rel (%p2784_p8) target bundleno = 260 (0x104), region = 84  ;;  %587 = vst.msk [vmem:[#allocation2] sm:$0xff] (!%p2784_p8), %vm586_vm0, %v585_v0 }
 0x104 PF: > { %v1741_v1 = vld [vmem:[%s2522_s9] sm:$0xff]   ;;  %v2114_v2 = vmov 0.0   ;;  %v1743_v4 = vld [vmem:[%s2522_s9 + $0x8] sm:$0xff]   ;;  %vm2115_vm1 = vmmov 0   ;;  %v588_v7 = vld [vmem:[%s462_s15] sm:$0xff]  ;;  %vm613_vm2 = vcmask 261120  }
 0x105   : > { %1582 = vmatprep.subr.bf16.mxu0 %v2114_v2  ;;  %1590 = vmatprep.subr.bf16.mxu1 %v2114_v2  ;;  %v1742_v3 = vld [vmem:[%s2520_s18] sm:$0xff]   ;;  %v1744_v5 = vld [vmem:[%s2520_s18 + $0x8] sm:$0xff]   ;;  %v591_v9 = vpack.c.bf16 %v588_v7, %v588_v7  ;;  %v1745_v10 = vld [vmem:[%s2522_s9 + $0x10] sm:$0xff]   ;;  %s1185_s22 = sadd.s32 1, %s2349_s28 }
 0x106   : > { %1583 = vmatpush3.bf16.msra.mxu0 %v1741_v1  ;;  %1586 = vmatprep.mubr.msk.bf16.mxu0 %vm2115_vm1, %v2114_v2  ;;  %v590_v6 = vld [vmem:[#allocation2] sm:$0xff]  ;;  %v1746_v11 = vld [vmem:[%s2520_s18 + $0x10] sm:$0xff]   ;;  %v1747_v12 = vld [vmem:[%s2522_s9 + $0x18] sm:$0xff]   ;;  %p1546_p12 = scmp.ge.s32.totalorder %s1185_s22, 3 }
 0x107   : > { %1591 = vmatpush3.bf16.msra.mxu1 %v1742_v3  ;;  %1584 = vmatprep.subr.bf16.mxu0 %v2114_v2  ;;  %v592_v8 = vpack.c.bf16 %v590_v6, %v590_v6  ;;  %v1748_v13 = vld [vmem:[%s2520_s18 + $0x18] sm:$0xff]   ;;  %v1749_v14 = vld [vmem:[%s2522_s9 + $0x20] sm:$0xff]   ;;  %v1751_v16 = vld [vmem:[%s2522_s9 + $0x28] sm:$0xff]  }
 0x108   : > { %1592 = vmatprep.subr.bf16.mxu1 %v2114_v2  ;;  %1594 = vmatprep.mubr.msk.bf16.mxu1 %vm2115_vm1, %v2114_v2  ;;  %v1750_v15 = vld [vmem:[%s2520_s18 + $0x20] sm:$0xff]   ;;  %v1752_v17 = vld [vmem:[%s2520_s18 + $0x28] sm:$0xff]   ;;  %v1753_v18 = vld [vmem:[%s2522_s9 + $0x30] sm:$0xff]  }
 0x109   : > { %v1754_v19 = vld [vmem:[%s2520_s18 + $0x30] sm:$0xff]   ;;  %v1755_v20 = vld [vmem:[%s2522_s9 + $0x38] sm:$0xff]   ;;  %v1494_v25 = vld [vmem:[%s2530_s11] ss:$0 sm:$0xff] }
 0x10a   : > { %1585 = vmatpush3.bf16.msra.mxu0 %v1743_v4  ;;  %v1756_v21 = vld [vmem:[%s2520_s18 + $0x38] sm:$0xff]   ;;  %v1510_v37 = vld [vmem:[%s2530_s11 + $0x1] ss:$0 sm:$0xff]  ;;  %v1526_v49 = vld [vmem:[%s2530_s11 + $0x2] ss:$0 sm:$0xff] }
 0x10b   : > { %1593 = vmatpush3.bf16.msra.mxu1 %v1744_v5  ;;  %1598 = vmatprep.subr.bf16.mxu0 %v2114_v2  ;;  %v1542_v61 = vld [vmem:[%s2530_s11 + $0x3] ss:$0 sm:$0xff] }
 0x10c   : > { %1606 = vmatprep.subr.bf16.mxu1 %v2114_v2 }
 0x10d   : > { %1587 = vmatmul.mubr.msk.bf16.vlgmr.msra.gmra.mrb[0].mxu0 %vm613_vm2, %v592_v8 }
 0x10e   : > { %1595 = vmatmul.mubr.msk.bf16.vlgmr.msra.gmra.mrb[0].mxu1 %vm613_vm2, %v591_v9  ;;  %1599 = vmatpush3.bf16.msra.mxu0 %v1745_v10 }
 0x10f   : > { %1607 = vmatpush3.bf16.msra.mxu1 %v1746_v11  ;;  %1600 = vmatprep.subr.bf16.mxu0 %v2114_v2 }
 0x110   : > { %1608 = vmatprep.subr.bf16.mxu1 %v2114_v2  ;;  %1602 = vmatprep.mubr.msk.bf16.mxu0 %vm2115_vm1, %v2114_v2 }
 0x111   : > { %1610 = vmatprep.mubr.msk.bf16.mxu1 %vm2115_vm1, %v2114_v2 }
 0x112   : > { %1601 = vmatpush3.bf16.msra.mxu0 %v1747_v12 }
 0x113   : > { %1609 = vmatpush3.bf16.msra.mxu1 %v1748_v13  ;;  %1614 = vmatprep.subr.bf16.mxu0 %v2114_v2 }
 0x114   : > { %1622 = vmatprep.subr.bf16.mxu1 %v2114_v2 }
 0x115   : > { %1603 = vmatmul.mubr.msk.bf16.vlgmr.msra.gmra.mrb[4].mxu0 %vm613_vm2, %v592_v8 }
 0x116   : > { %1611 = vmatmul.mubr.msk.bf16.vlgmr.msra.gmra.mrb[4].mxu1 %vm613_vm2, %v591_v9  ;;  %1615 = vmatpush3.bf16.msra.mxu0 %v1749_v14 }
 0x117   : > { %1623 = vmatpush3.bf16.msra.mxu1 %v1750_v15  ;;  %1616 = vmatprep.subr.bf16.mxu0 %v2114_v2 }
 0x118   : > { %1624 = vmatprep.subr.bf16.mxu1 %v2114_v2  ;;  %1618 = vmatprep.mubr.msk.bf16.mxu0 %vm2115_vm1, %v2114_v2 }
 0x119   : > { %1626 = vmatprep.mubr.msk.bf16.mxu1 %vm2115_vm1, %v2114_v2 }
 0x11a   : > { %1617 = vmatpush3.bf16.msra.mxu0 %v1751_v16 }
 0x11b   : > { %1625 = vmatpush3.bf16.msra.mxu1 %v1752_v17  ;;  %1630 = vmatprep.subr.bf16.mxu0 %v2114_v2 }
 0x11c   : > { %1638 = vmatprep.subr.bf16.mxu1 %v2114_v2 }
 0x11d   : > { %1619 = vmatmul.mubr.msk.bf16.vlgmr.msra.gmra.mrb[8].mxu0 %vm613_vm2, %v592_v8 }
 0x11e   : > { %1627 = vmatmul.mubr.msk.bf16.vlgmr.msra.gmra.mrb[8].mxu1 %vm613_vm2, %v591_v9  ;;  %1631 = vmatpush3.bf16.msra.mxu0 %v1753_v18 }
 0x11f   : > { %1639 = vmatpush3.bf16.msra.mxu1 %v1754_v19  ;;  %1632 = vmatprep.subr.bf16.mxu0 %v2114_v2 }
 0x120   : > { %1640 = vmatprep.subr.bf16.mxu1 %v2114_v2  ;;  %1634 = vmatprep.mubr.msk.bf16.mxu0 %vm2115_vm1, %v2114_v2 }
 0x121   : > { %1642 = vmatprep.mubr.msk.bf16.mxu1 %vm2115_vm1, %v2114_v2 }
 0x122   : > { %1633 = vmatpush3.bf16.msra.mxu0 %v1755_v20 }
 0x123   : > { %1641 = vmatpush3.bf16.msra.mxu1 %v1756_v21 }
 0x125   : > { %1635 = vmatmul.mubr.msk.bf16.vlgmr.msra.gmra.mrb[12].mxu0 %vm613_vm2, %v592_v8 }
 0x126   : > { %1643 = vmatmul.mubr.msk.bf16.vlgmr.msra.gmra.mrb[12].mxu1 %vm613_vm2, %v591_v9 }
 0x1e0   : > { %v651_v22 = vpop.f32.mrb[0].mxu0 }
 0x1e1   : > { %v706_v23 = vpop.f32.mrb[0].mxu1  ;;  %v1588_v24 = vpop.f32.mrb[1].mxu0 }
 0x1e2   : > { %v707_v26 = vadd.f32 %v706_v23, %v651_v22  ;;  %v1596_v27 = vpop.f32.mrb[1].mxu1  ;;  %v654_v28 = vpop.f32.mrb[2].mxu0 }
 0x1e3   : > { %v709_v29 = vpop.f32.mrb[2].mxu1  ;;  %v1589_v30 = vpop.f32.mrb[3].mxu0 }
 0x1e4   : > { %v1597_v31 = vpop.f32.mrb[3].mxu1  ;;  %v719_v32 = vadd.f32 %v1494_v25, %v707_v26 }
 0x1e6   : > { %v1089_v33 = vsel %vm613_vm2, %v719_v32, 0.0 }
 0x1e7   : > { %1090 = vadd.xlane.f32.xlu0 %v1089_v33  ;;  %v1142_v33 = vld [vmem:[%s2532_s20] sm:$0xff] }
 0x1e8   : > { %v776_v34 = vpop.f32.mrb[4].mxu0 }
 0x1e9   : > { %v828_v35 = vpop.f32.mrb[4].mxu1  ;;  %v1604_v36 = vpop.f32.mrb[5].mxu0 }
 0x1ea   : > { %v829_v38 = vadd.f32 %v828_v35, %v776_v34  ;;  %v1612_v39 = vpop.f32.mrb[5].mxu1  ;;  %v779_v40 = vpop.f32.mrb[6].mxu0  ;;  %v1150_v36 = vld [vmem:[%s2545_s23] sm:$0xff] }
 0x1eb   : > { %v831_v41 = vpop.f32.mrb[6].mxu1  ;;  %v1605_v42 = vpop.f32.mrb[7].mxu0 }
 0x1ec   : > { %v1613_v43 = vpop.f32.mrb[7].mxu1  ;;  %v842_v44 = vadd.f32 %v1510_v37, %v829_v38 }
 0x1ed   : > { %v1143_v43 = vld [vmem:[%s2532_s20 + $0x8] sm:$0xff] }
 0x1ee   : > { %v1092_v45 = vsel %vm613_vm2, %v842_v44, 0.0 }
 0x1ef   : > { %1093 = vadd.xlane.f32.xlu0 %v1092_v45 }
 0x1f0   : > { %v899_v46 = vpop.f32.mrb[8].mxu0 }
 0x1f1   : > { %v951_v47 = vpop.f32.mrb[8].mxu1  ;;  %v1620_v48 = vpop.f32.mrb[9].mxu0 }
 0x1f2   : > { %v952_v50 = vadd.f32 %v951_v47, %v899_v46  ;;  %v1628_v51 = vpop.f32.mrb[9].mxu1  ;;  %v902_v52 = vpop.f32.mrb[10].mxu0  ;;  %v1151_v46 = vld [vmem:[%s2545_s23 + $0x8] sm:$0xff] }
 0x1f3   : > { %v954_v53 = vpop.f32.mrb[10].mxu1  ;;  %v1621_v54 = vpop.f32.mrb[11].mxu0 }
 0x1f4   : > { %v1629_v55 = vpop.f32.mrb[11].mxu1  ;;  %v965_v56 = vadd.f32 %v1526_v49, %v952_v50  ;;  %v1144_v53 = vld [vmem:[%s2532_s20 + $0x10] sm:$0xff] }
 0x1f6   : > { %v1095_v57 = vsel %vm613_vm2, %v965_v56, 0.0 }
 0x1f7   : > { %1096 = vadd.xlane.f32.xlu1 %v1095_v57  ;;  %v1152_v57 = vld [vmem:[%s2545_s23 + $0x10] sm:$0xff] }
 0x1f8   : > { %v1022_v58 = vpop.f32.mrb[12].mxu0 }
 0x1f9   : > { %v1074_v59 = vpop.f32.mrb[12].mxu1  ;;  %v1636_v60 = vpop.f32.mrb[13].mxu0 }
 0x1fa   : > { %v1075_v62 = vadd.f32 %v1074_v59, %v1022_v58  ;;  %v1644_v63 = vpop.f32.mrb[13].mxu1  ;;  %v1025_v0 = vpop.f32.mrb[14].mxu0 }
 0x1fb   : > { %v1077_v1 = vpop.f32.mrb[14].mxu1  ;;  %v1637_v2 = vpop.f32.mrb[15].mxu0  ;;  %v1153_v63 = vld [vmem:[%s2545_s23 + $0x18] sm:$0xff] }
 0x1fc   : > { %v1645_v3 = vpop.f32.mrb[15].mxu1  ;;  %v1088_v4 = vadd.f32 %v1542_v61, %v1075_v62  ;;  %v1145_v61 = vld [vmem:[%s2532_s20 + $0x18] sm:$0xff] }
 0x1fe   : > { %v1098_v5 = vsel %vm613_vm2, %v1088_v4, 0.0 }
 0x1ff   : > { %1099 = vadd.xlane.f32.xlu1 %v1098_v5 }
 0x274   : > { %v1091_v6 = vpop.xlane.xlu0 %1090 }
 0x275   : > { %v1102_v7 = vmul.f32 0.03125, %v1091_v6 }
 0x277   : > { %v1106_v8 = vsub.f32 %v719_v32, %v1102_v7  ;;  %v589_v7 = vld [vmem:[%s2543_s4] sm:$0xff] }
 0x279   : > { %v1110_v9 = vmul.f32 %v1106_v8, %v1106_v8 }
 0x27b   : > { %v1114_v10 = vsel %vm613_vm2, %v1110_v9, 0.0 }
 0x27c   : > { %1115 = vadd.xlane.f32.xlu0 %v1114_v10  ;;  %v1094_v11 = vpop.xlane.xlu0 %1093 }
 0x27d   : > { %v1103_v12 = vmul.f32 0.03125, %v1094_v11 }
 0x27f   : > { %v1107_v13 = vsub.f32 %v842_v44, %v1103_v12 }
 0x281   : > { %v1111_v14 = vmul.f32 %v1107_v13, %v1107_v13 }
 0x283   : > { %v1117_v15 = vsel %vm613_vm2, %v1111_v14, 0.0 }
 0x284   : > { %v1097_v16 = vpop.xlane.xlu1 %1096  ;;  %1118 = vadd.xlane.f32.xlu1 %v1117_v15 }
 0x285   : > { %v1104_v17 = vmul.f32 0.03125, %v1097_v16 }
 0x287   : > { %v1108_v18 = vsub.f32 %v965_v56, %v1104_v17 }
 0x289   : > { %v1112_v19 = vmul.f32 %v1108_v18, %v1108_v18 }
 0x28b   : > { %v1120_v20 = vsel %vm613_vm2, %v1112_v19, 0.0 }
 0x28c   : > { %1121 = vadd.xlane.f32.xlu0 %v1120_v20  ;;  %v1100_v21 = vpop.xlane.xlu1 %1099 }
 0x28d   : > { %v1105_v22 = vmul.f32 0.03125, %v1100_v21 }
 0x28f   : > { %v1109_v23 = vsub.f32 %v1088_v4, %v1105_v22 }
 0x291   : > { %v1113_v24 = vmul.f32 %v1109_v23, %v1109_v23 }
 0x293   : > { %v1123_v25 = vsel %vm613_vm2, %v1113_v24, 0.0 }
 0x294   : > { %1124 = vadd.xlane.f32.xlu1 %v1123_v25 }
 0x309   : > { %v1116_v26 = vpop.xlane.xlu0 %1115 }
 0x30a   : > { %v1126_v27 = vmul.f32 0.03125, %v1116_v26 }
 0x30c   : > { %v1130_v28 = vadd.f32 1e-05, %v1126_v27 }
 0x30e   : > { %1757 = vrsqrt.f32 %v1130_v28 }
 0x311   : > { %v1119_v29 = vpop.xlane.xlu1 %1118 }
 0x312   : > { %v1127_v30 = vmul.f32 0.03125, %v1119_v29 }
 0x314   : > { %v1131_v31 = vadd.f32 1e-05, %v1127_v30 }
 0x316   : > { %1759 = vrsqrt.f32 %v1131_v31 }
 0x318   : > { %v1758_v32 = vpop.eup %1757 }
 0x319   : > { %v1138_v34 = vmul.f32 %v1758_v32, %v1106_v8  ;;  %v1122_v35 = vpop.xlane.xlu0 %1121 }
 0x31a   : > { %v1128_v37 = vmul.f32 0.03125, %v1122_v35 }
 0x31b   : > { %v1146_v38 = vmul.f32 %v1142_v33, %v1138_v34 }
 0x31c   : > { %v1132_v39 = vadd.f32 1e-05, %v1128_v37 }
 0x31d   : > { %v1154_v40 = vadd.f32 %v1150_v36, %v1146_v38 }
 0x31e   : > { %1761 = vrsqrt.f32 %v1132_v39 }
 0x31f   : > { %v1543_v41 = vmul.f32 -1.442695, %v1154_v40 }
 0x320   : > { %v1760_v42 = vpop.eup %1759 }
 0x321   : > { %v1139_v44 = vmul.f32 %v1760_v42, %v1107_v13  ;;  %v1125_v45 = vpop.xlane.xlu1 %1124  ;;  %1763 = vpow2.f32 %v1543_v41 }
 0x322   : > { %v1129_v47 = vmul.f32 0.03125, %v1125_v45 }
 0x323   : > { %v1147_v48 = vmul.f32 %v1143_v43, %v1139_v44 }
 0x324   : > { %v1133_v49 = vadd.f32 1e-05, %v1129_v47 }
 0x325   : > { %v1155_v50 = vadd.f32 %v1151_v46, %v1147_v48 }
 0x326   : > { %1765 = vrsqrt.f32 %v1133_v49 }
 0x327   : > { %v1544_v51 = vmul.f32 -1.442695, %v1155_v50 }
 0x328   : > { %v1762_v52 = vpop.eup %1761 }
 0x329   : > { %1767 = vpow2.f32 %v1544_v51  ;;  %v1140_v54 = vmul.f32 %v1762_v52, %v1108_v18 }
 0x32b   : > { %v1764_v55 = vpop.eup %1763  ;;  %v1148_v56 = vmul.f32 %v1144_v53, %v1140_v54 }
 0x32c   : > { %v1161_v58 = vadd.f32 1.0, %v1764_v55 }
 0x32d   : > { %v1156_v60 = vadd.f32 %v1152_v57, %v1148_v56 }
 0x32e   : > { %1769 = vrcp.f32 %v1161_v58 }
 0x32f   : > { %1771 = vtanh.f32 %v1156_v60 }
 0x330   : > { %v1766_v59 = vpop.eup %1765 }
 0x331   : > { %v1141_v62 = vmul.f32 %v1766_v59, %v1109_v23 }
 0x333   : > { %v1768_v0 = vpop.eup %1767  ;;  %v1149_v1 = vmul.f32 %v1145_v61, %v1141_v62 }
 0x334   : > { %v1167_v2 = vadd.f32 1.0, %v1768_v0 }
 0x335   : > { %v1157_v3 = vadd.f32 %v1153_v63, %v1149_v1 }
 0x336   : > { %1773 = vrcp.f32 %v1167_v2 }
 0x337   : > { %v1545_v4 = vmul.f32 -1.442695, %v1157_v3 }
 0x338   : > { %v1770_v5 = vpop.eup %1769 }
 0x339   : > { %1775 = vpow2.f32 %v1545_v4  ;;  %v1772_v6 = vpop.eup %1771 }
 0x33a   : > { %v1178_v10 = vmul.f32 %v1772_v6, %v1770_v5 }
 0x340   : > { %v1774_v8 = vpop.eup %1773 }
 0x341   : > { %v1177_v9 = vmul.f32 %v1774_v8, %v589_v7 }
 0x343   : > { %v1776_v11 = vpop.eup %1775  ;;  %v1179_v12 = vadd.f32 %v1178_v10, %v1177_v9 }
 0x344   : > { %v1173_v13 = vadd.f32 1.0, %v1776_v11 }
 0x345   : > { %1777 = vtanh.f32 %v1179_v12  ;;  %1184 = vst.msk [vmem:[%s575_s26] sm:$0xff] %vm613_vm2, %v1179_v12 }
 0x346   : > { %1779 = vrcp.f32 %v1173_v13 }
 0x34f   : > { %v1778_v14 = vpop.eup %1777  ;;  %1189 = sbr.rel (%p1546_p12) target bundleno = 854 (0x356), region = 88 }
 0x350   : > { %v1780_v15 = vpop.eup %1779 }
 0x351   : > { %v1181_v16 = vmul.f32 %v1780_v15, %v1778_v14 }
 0x353   : > { %v1182_v17 = vadd.f32 %v1181_v16, %v1156_v60 }
 0x355   : > { %1183 = vst.msk [vmem:[%s568_s3] sm:$0xff] %vm613_vm2, %v1182_v17  ;;  %1190 = vst.msk [vmem:[#allocation2] sm:$0xff] (!%p1546_p12), %vm613_vm2, %v1182_v17 }
 0x356 PF: > { %s1549_s16 = sshll.u32 %s2349_s28, 7  ;;  %s1210_s13 = sshll.u32 %s568_s3, 4  ;;  %s1211_s13 = int_to_ptr.vmem [resolvable:$true] %s1210_s13 }
 0x357   : > { %s2646_s18 = scalar_lea.hbm %s2720_s8, %s1549_s16  ;;  %s1192_s9 = scalar_lea.sflag [#allocation5], %s2509_s14 }
 0x358   : > { %s1989_s24 = scalar_lea.vmem %s1211_s13, 128  ;;  %p2785_p10 = scmp.ne.s32.totalorder %s2762_s27, 0 }
 0x359   : > { %p1990_p4 = scmp.ne.s32.totalorder %s1211_s13, %s1989_s24  ;;  %s2116_s21 = smov [#allocation15]  }
 0x35a   : > { %s1993_s11 = sshll.u32 %s2116_s21, 4  ;;  %s1994_s11 = int_to_ptr.vmem [resolvable:$false] %s1993_s11 }
 0x35b   : > { %p1991_p5 = pnand %p1990_p4, %p2785_p10  ;;  %s1995_s19 = scalar_lea.vmem %s1994_s11, 256 }
 0x35c   : > { %p1996_p1 = scmp.lt.s32.totalorder %s1211_s13, %s1994_s11  ;;  %p1997_p11 = scmp.lt.s32.totalorder %s1995_s19, %s1989_s24 }
 0x35d   : > { %p1992_p7 = pneg %p1991_p5 }
 0x35e   : > { %p1998_p0 = por %p1997_p11, %p1996_p1 }
 0x360   : > { %p1999_p6 = pnand %p1998_p0, %p1992_p7 }
 0x362   : > { %2002 = shalt.err (!%p1999_p6)
}
 0x363   : > { %s2003_s20 = scalar_lea.hbm %s2646_s18, 128  ;;  %s2007_s29 = scalar_lea.hbm %s2720_s8, 384 }
 0x364   : > { %p2004_p3 = scmp.ne.s32.totalorder %s2646_s18, %s2003_s20  ;;  %p2008_p2 = scmp.lt.u32.totalorder %s2646_s18, %s2720_s8 }
 0x365   : > { %p2009_p8 = scmp.lt.u32.totalorder %s2007_s29, %s2003_s20  ;;  %p2011_p4 = scmp.lt.u32.totalorder %s2003_s20, %s2646_s18 }
 0x366   : > { %p2005_p9 = pnand %p2004_p3, %p2785_p10 }
 0x367   : > { %p2010_p12 = por %p2009_p8, %p2008_p2 }
 0x368   : > { %p2006_p13 = pneg %p2005_p9 }
 0x369   : > { %p2012_p5 = por %p2011_p4, %p2010_p12 }
 0x36b   : > { %p2013_p7 = pnand %p2012_p5, %p2006_p13 }
 0x36d   : > { %2016 = shalt.err (!%p2013_p7)
}
 0x36e   : > { %1662 = dma.vmem_to_hbm [thread:$0]  (%p2785_p10), %s1211_s13, 128, %s2646_s18, %s1192_s9  }
 0x36f   : > { %s2786_s22 = sld [smem:[#allocation33_spill]]  ;;  %s1223_s1 = sshll.u32 %s575_s26, 4  ;;  %s1224_s1 = int_to_ptr.vmem [resolvable:$true] %s1223_s1 }
 0x370   : > { %s1197_s24 = scalar_lea.sflag [#allocation17], %s2509_s14  ;;  %s2017_s21 = scalar_lea.vmem %s1224_s1, 128 }
 0x371   : > { %p2018_p1 = scmp.ne.s32.totalorder %s1224_s1, %s2017_s21  ;;  %s2117_s11 = smov [#allocation16]  }
 0x372   : > { %s2021_s19 = sshll.u32 %s2117_s11, 4  ;;  %s2022_s19 = int_to_ptr.vmem [resolvable:$false] %s2021_s19 }
 0x373   : > { %p2019_p11 = pnand %p2018_p1, %p2785_p10  ;;  %s2023_s20 = scalar_lea.vmem %s2022_s19, 256 }
 0x374   : > { %p2024_p6 = scmp.lt.s32.totalorder %s1224_s1, %s2022_s19  ;;  %p2025_p3 = scmp.lt.s32.totalorder %s2023_s20, %s2017_s21 }
 0x375   : > { %s2673_s15 = scalar_lea.hbm %s2786_s22, %s1549_s16  ;;  %p2020_p0 = pneg %p2019_p11 }
 0x376   : > { %p2026_p9 = por %p2025_p3, %p2024_p6 }
 0x378   : > { %p2027_p13 = pnand %p2026_p9, %p2020_p0 }
 0x37a   : > { %2030 = shalt.err (!%p2027_p13)
}
 0x37b   : > { %s2031_s28 = scalar_lea.hbm %s2673_s15, 128  ;;  %s2035_s26 = scalar_lea.hbm %s2786_s22, 384 }
 0x37c   : > { %p2032_p2 = scmp.ne.s32.totalorder %s2673_s15, %s2031_s28  ;;  %p2036_p4 = scmp.lt.u32.totalorder %s2673_s15, %s2786_s22 }
 0x37d   : > { %p2037_p5 = scmp.lt.u32.totalorder %s2035_s26, %s2031_s28  ;;  %p2039_p1 = scmp.lt.u32.totalorder %s2031_s28, %s2673_s15 }
 0x37e   : > { %p2033_p8 = pnand %p2032_p2, %p2785_p10 }
 0x37f   : > { %p2038_p7 = por %p2037_p5, %p2036_p4 }
 0x380   : > { %p2034_p12 = pneg %p2033_p8 }
 0x381   : > { %p2040_p11 = por %p2039_p1, %p2038_p7 }
 0x383   : > { %p2041_p0 = pnand %p2040_p11, %p2034_p12 }
 0x385   : > { %2044 = shalt.err (!%p2041_p0)
}
 0x386   : > { %1663 = dma.vmem_to_hbm [thread:$0]  (%p2785_p10), %s1224_s1, 128, %s2673_s15, %s1197_s24  }
 0x387 PF: > { %s2787_s13 = sld [smem:[#allocation24_spill]]  ;;  %s2788_s9 = sld [smem:[#allocation28_spill]] }
 0x388   : > { %p1699_p6 = scmp.ge.s32.totalorder %s2099_s12, 2 }
 0x38d   : > { %s1235_s30 = sand.u32 1, %s2787_s13   ;;  %p2789_p3 = scmp.ne.s32.totalorder %s2788_s9, 0 }
 0x38e   : > { %s1236_s6 = scalar_lea.sflag [#allocation5], %s1235_s30 }
 0x38f   : > { %p1690_p9 = pnand %p1699_p6, %p2789_p3 }
 0x391   : > { %2078 = dma.done.wait (!%p1690_p9), %s1236_s6, 128  }
 0x392   : > { %2080 = vsyncadd (!%p1690_p9), %s1236_s6, 4294967168  ;;  %s1245_s29 = scalar_lea.sflag [#allocation17], %s1235_s30 }
 0x393   : > { %2082 = dma.done.wait (!%p1690_p9), %s1245_s29, 128  }
 0x394   : > { %2084 = vsyncadd (!%p1690_p9), %s1245_s29, 4294967168  ;;  %s2790_s12 = sld [smem:[#allocation26_spill]]  ;;  %s2791_s25 = sld [smem:[#allocation25_spill]] }
 0x395   : > { %s2792_s11 = sld [smem:[#allocation27_spill]]  ;;  %s2793_s30 = smov %s2091_s10 }
 0x39a   : > { %p33_p10 = scmp.ge.s32.totalorder %s2790_s12, 5   ;;  %s2794_s10 = smov %s2791_s25 }
 0x39c   :  { %35 = sbr.rel (!%p33_p10) target bundleno = 18 (0x12), region = 198 }
 0x3a3   :  { %1250 = vsyncpa [#allocation4], 1 }
 0x3a4   :  { %1252 = vsyncpa [#allocation4 + $0x1], 1 }
 0x3a5   :  { %1253 = vsyncpa [#allocation7], 1 }
 0x3a6   :  { %1255 = vsyncpa [#allocation7 + $0x1], 1 }
 0x3a7   :  { %1256 = vsyncpa [#allocation10], 1 }
 0x3a8   :  { %1258 = vsyncpa [#allocation10 + $0x1], 1 }
 0x3a9   :  { %1259 = vsyncpa [#allocation13], 1 }
 0x3aa   :  { %1261 = vsyncpa [#allocation13 + $0x1], 1 }
 0x3ab   :  { %1262 = vsyncpa [#allocation5], 1 }
 0x3ac   :  { %1264 = vsyncpa [#allocation5 + $0x1], 1 }
 0x3ad   :  { %1265 = vsyncpa [#allocation17], 1 }
 0x3ae   :  { %1267 = vsyncpa [#allocation17 + $0x1], 1 }

</bundles_post_ra>
